<compile_context>
chip_gen: v6e
topology: v6e:2x2x1
jax: 0.10.0
libtpu: 0.0.40
codegen_flags: <defaults>
</compile_context>

<pallas_src>
import jax
import jax.numpy as jnp
from jax.experimental import pallas as pl


def _round_up(n, m):
    return ((n + m - 1) // m) * m


def rnn_kernel(x_ref, wi_ref, b_ref, wh_ref, wo_ref, bo_ref, out_ref):
    T, B, d_in = x_ref.shape
    Hp = wh_ref.shape[1]

    # ---- input projection, hoisted out of the recurrence -------------------
    # u[t] = x_t @ Wi^T + (bi + bh).  d_in is tiny (1 for this module), so a
    # VPU broadcast-multiply beats a degenerate K=1 MXU matmul.  Kept as values
    # (T*B*Hp = 8 vregs here), no VMEM scratch round trip.
    x = x_ref[...]                                    # (T, B, d_in)  f32
    wi = wi_ref[...]                                  # (d_in, Hp)    f32
    u = x[:, :, 0:1] * wi[0:1, :]                     # (T, B, Hp)
    for d in range(1, d_in):                          # static; d_in == 1 here
        u = u + x[:, :, d:d + 1] * wi[d:d + 1, :]
    u = u + b_ref[...]                                # folded bias bi + bh, f32

    # ---- sequential recurrence (the only true time dependence) -------------
    # bf16 matmul operands -> single MXU pass per step; f32 accumulate/add/tanh.
    wh = wh_ref[...]                                  # (Hp, Hp) bf16, resident
    h = jnp.zeros((B, Hp), jnp.float32)
    for t in range(T):                                # static unroll (T == 8)
        s = jnp.dot(h.astype(jnp.bfloat16), wh,
                    preferred_element_type=jnp.float32)
        h = jnp.tanh(s + u[t])                        # static slice of u

    # ---- output head + numerically-stable softmax (final step only), f32 ---
    o = jnp.dot(h, wo_ref[...], preferred_element_type=jnp.float32) + bo_ref[...]
    o = o - jnp.max(o, axis=-1, keepdims=True)
    e = jnp.exp(o)
    out_ref[...] = e * pl.reciprocal(jnp.sum(e, axis=-1, keepdims=True),
                                     approx=False)


def rnn_forward(seq, params):
    """seq: (B, T, d_in) float32. Returns softmax output at the last step, (B, d_out)."""
    Wi, bi, Wh, bh, Wo, bo = params
    B, T, d_in = seq.shape
    d_h = Wh.shape[0]
    d_out = Wo.shape[0]
    Hp = _round_up(d_h, 128)       # lane-pad hidden dim (32 -> 128); use 256 when d_h scales on v6e/v7x
    Op = _round_up(d_out, 128)     # lane-pad output dim (16 -> 128)

    # glue: time-major layout; pre-transposed, zero-padded weights so the kernel
    # computes y = x @ W + b on lane-dense 128-wide operands.
    seq_tm = jnp.transpose(seq, (1, 0, 2)).astype(jnp.float32)          # (T, B, d_in)
    WiT = jnp.zeros((d_in, Hp), jnp.float32).at[:, :d_h].set(
        Wi.T.astype(jnp.float32))                                       # (d_in, Hp)
    # bf16 recurrent weight: one MXU pass/step, half the resident vreg footprint.
    WhT = jnp.zeros((Hp, Hp), jnp.float32).at[:d_h, :d_h].set(
        Wh.T.astype(jnp.float32)).astype(jnp.bfloat16)                  # (Hp, Hp) bf16
    WoT = jnp.zeros((Hp, Op), jnp.float32).at[:d_h, :d_out].set(
        Wo.T.astype(jnp.float32))                                       # (Hp, Op)
    b = jnp.zeros((1, Hp), jnp.float32).at[0, :d_h].set(
        (bi + bh).astype(jnp.float32))                                  # folded bias
    # padded classes get a huge negative logit -> exp underflows to exactly 0,
    # so the softmax over the real d_out classes is unchanged.
    bo_p = jnp.full((1, Op), -1e30, jnp.float32).at[0, :d_out].set(
        bo.astype(jnp.float32))

    out_padded = pl.pallas_call(
        rnn_kernel,
        out_shape=jax.ShapeDtypeStruct((B, Op), jnp.float32),
    )(seq_tm, WiT, b, WhT, WoT, bo_p)

    return out_padded[:, :d_out]


def rnn_reference(seq, params, bf16_recurrent_matmul=False):
    """Plain-JAX reference mirroring the PyTorch module's forward.

    With bf16_recurrent_matmul=True it mirrors the kernel's numerics (bf16
    operands on the h @ Wh^T matmul, f32 accumulation / tanh / softmax).
    """
    Wi, bi, Wh, bh, Wo, bo = params
    B, T, _ = seq.shape
    d_h = Wh.shape[0]
    h = jnp.zeros((B, d_h), jnp.float32)
    WhT = Wh.T.astype(jnp.bfloat16) if bf16_recurrent_matmul else Wh.T
    ot = None
    for t in range(T):
        x = seq[:, t, :]
        hh = h.astype(jnp.bfloat16) if bf16_recurrent_matmul else h
        s = jnp.dot(hh, WhT, preferred_element_type=jnp.float32)
        h = jnp.tanh(s + x @ Wi.T + bi + bh)
        o = h @ Wo.T + bo
        ot = jax.nn.softmax(o, axis=1)
    return ot


def init_params(key, d_in_x, d_h, d_out):
    ks = jax.random.split(key, 6)

    # deterministic, PyTorch-Linear-like uniform init (synthetic weights)
    def u(k, shape, fan_in):
        bound = 1.0 / jnp.sqrt(fan_in)
        return jax.random.uniform(k, shape, jnp.float32, -bound, bound)

    Wi = u(ks[0], (d_h, d_in_x), d_in_x)
    bi = u(ks[1], (d_h,), d_in_x)
    Wh = u(ks[2], (d_h, d_h), d_h)
    bh = u(ks[3], (d_h,), d_h)
    Wo = u(ks[4], (d_out, d_h), d_h)
    bo = u(ks[5], (d_out,), d_h)
    return (Wi, bi, Wh, bh, Wo, bo)


if __name__ == "__main__":
    # small shapes consistent with the module: batch=8, seq len T=8,
    # d_in_x=1 (temperature), hidden=32, d_out=16 (cities)
    B, T, d_in_x, d_h, d_out = 8, 8, 1, 32, 16

    key = jax.random.PRNGKey(0)
    k_seq, k_par = jax.random.split(key)
    seq = jax.random.normal(k_seq, (B, T, d_in_x), jnp.float32)
    params = init_params(k_par, d_in_x, d_h, d_out)

    out = rnn_forward(seq, params)
    out = jax.block_until_ready(out)
    assert out.shape == (B, d_out)

    # tight check vs. a reference mirroring the kernel's bf16-operand numerics
    ref_bf16 = rnn_reference(seq, params, bf16_recurrent_matmul=True)
    assert jnp.allclose(out, ref_bf16, atol=2e-3, rtol=2e-3), \
        "mismatch vs bf16-operand reference"

    # loose check vs. the exact f32 reference (slack for the bf16 mantissa)
    ref_f32 = rnn_reference(seq, params, bf16_recurrent_matmul=False)
    assert jnp.allclose(out, ref_f32, atol=2e-2, rtol=0.0), \
        "mismatch vs f32 reference"

    print("KERNEL_OK")
</pallas_src>

<mosaic_0001>
module attributes {stable_mosaic.version = 11 : i64} {
  func.func @rnn_kernel(%arg0: memref<8x8x1xf32, #tpu.memory_space<vmem>>, %arg1: memref<1x128xf32, #tpu.memory_space<vmem>>, %arg2: memref<1x128xf32, #tpu.memory_space<vmem>>, %arg3: memref<128x128xbf16, #tpu.memory_space<vmem>>, %arg4: memref<128x128xf32, #tpu.memory_space<vmem>>, %arg5: memref<1x128xf32, #tpu.memory_space<vmem>>, %arg6: memref<8x128xf32, #tpu.memory_space<vmem>>) attributes {dimension_semantics = [], scalar_prefetch = 0 : i64, scratch_operands = 0 : i64, tpu.core_type = #tpu.core_type<tc>} {
    %c0 = arith.constant 0 : index
    %c0_0 = arith.constant 0 : index
    %c0_1 = arith.constant 0 : index
    %0 = vector.load %arg0[%c0, %c0_0, %c0_1] : memref<8x8x1xf32, #tpu.memory_space<vmem>>, vector<8x8x1xf32>
    %c0_2 = arith.constant 0 : index
    %c0_3 = arith.constant 0 : index
    %1 = vector.load %arg1[%c0_2, %c0_3] : memref<1x128xf32, #tpu.memory_space<vmem>>, vector<1x128xf32>
    %2 = vector.shape_cast %1 : vector<1x128xf32> to vector<1x1x128xf32>
    %3 = vector.broadcast %0 : vector<8x8x1xf32> to vector<8x8x128xf32>
    %4 = vector.broadcast %2 : vector<1x1x128xf32> to vector<8x8x128xf32>
    %5 = arith.mulf %3, %4 : vector<8x8x128xf32>
    %c0_4 = arith.constant 0 : index
    %c0_5 = arith.constant 0 : index
    %6 = vector.load %arg2[%c0_4, %c0_5] : memref<1x128xf32, #tpu.memory_space<vmem>>, vector<1x128xf32>
    %7 = vector.shape_cast %6 : vector<1x128xf32> to vector<1x1x128xf32>
    %8 = vector.broadcast %7 : vector<1x1x128xf32> to vector<8x8x128xf32>
    %9 = arith.addf %5, %8 : vector<8x8x128xf32>
    %c0_6 = arith.constant 0 : index
    %c0_7 = arith.constant 0 : index
    %10 = vector.load %arg3[%c0_6, %c0_7] : memref<128x128xbf16, #tpu.memory_space<vmem>>, vector<128x128xbf16>
    %cst = arith.constant 0.000000e+00 : f32
    %11 = vector.broadcast %cst : f32 to vector<8x128xf32>
    %12 = arith.truncf %11 : vector<8x128xf32> to vector<8x128xbf16>
    %cst_8 = arith.constant dense<0.000000e+00> : vector<8x128xf32>
    %13 = tpu.matmul %12, %10, %cst_8 {dimension_numbers = #tpu.dot_dimension_numbers<[1], [0], [0], [1], [0, 0, 1, 1], [], []>} : vector<8x128xbf16>, vector<128x128xbf16>, vector<8x128xf32> -> vector<8x128xf32>
    %14 = vector.extract_strided_slice %9 {offsets = [0, 0, 0], sizes = [1, 8, 128], strides = [1, 1, 1]} : vector<8x8x128xf32> to vector<1x8x128xf32>
    %15 = vector.shape_cast %14 : vector<1x8x128xf32> to vector<8x128xf32>
    %16 = arith.addf %13, %15 : vector<8x128xf32>
    %17 = math.tanh %16 : vector<8x128xf32>
    %18 = arith.truncf %17 : vector<8x128xf32> to vector<8x128xbf16>
    %cst_9 = arith.constant dense<0.000000e+00> : vector<8x128xf32>
    %19 = tpu.matmul %18, %10, %cst_9 {dimension_numbers = #tpu.dot_dimension_numbers<[1], [0], [0], [1], [0, 0, 1, 1], [], []>} : vector<8x128xbf16>, vector<128x128xbf16>, vector<8x128xf32> -> vector<8x128xf32>
    %20 = vector.extract_strided_slice %9 {offsets = [1, 0, 0], sizes = [1, 8, 128], strides = [1, 1, 1]} : vector<8x8x128xf32> to vector<1x8x128xf32>
    %21 = vector.shape_cast %20 : vector<1x8x128xf32> to vector<8x128xf32>
    %22 = arith.addf %19, %21 : vector<8x128xf32>
    %23 = math.tanh %22 : vector<8x128xf32>
    %24 = arith.truncf %23 : vector<8x128xf32> to vector<8x128xbf16>
    %cst_10 = arith.constant dense<0.000000e+00> : vector<8x128xf32>
    %25 = tpu.matmul %24, %10, %cst_10 {dimension_numbers = #tpu.dot_dimension_numbers<[1], [0], [0], [1], [0, 0, 1, 1], [], []>} : vector<8x128xbf16>, vector<128x128xbf16>, vector<8x128xf32> -> vector<8x128xf32>
    %26 = vector.extract_strided_slice %9 {offsets = [2, 0, 0], sizes = [1, 8, 128], strides = [1, 1, 1]} : vector<8x8x128xf32> to vector<1x8x128xf32>
    %27 = vector.shape_cast %26 : vector<1x8x128xf32> to vector<8x128xf32>
    %28 = arith.addf %25, %27 : vector<8x128xf32>
    %29 = math.tanh %28 : vector<8x128xf32>
    %30 = arith.truncf %29 : vector<8x128xf32> to vector<8x128xbf16>
    %cst_11 = arith.constant dense<0.000000e+00> : vector<8x128xf32>
    %31 = tpu.matmul %30, %10, %cst_11 {dimension_numbers = #tpu.dot_dimension_numbers<[1], [0], [0], [1], [0, 0, 1, 1], [], []>} : vector<8x128xbf16>, vector<128x128xbf16>, vector<8x128xf32> -> vector<8x128xf32>
    %32 = vector.extract_strided_slice %9 {offsets = [3, 0, 0], sizes = [1, 8, 128], strides = [1, 1, 1]} : vector<8x8x128xf32> to vector<1x8x128xf32>
    %33 = vector.shape_cast %32 : vector<1x8x128xf32> to vector<8x128xf32>
    %34 = arith.addf %31, %33 : vector<8x128xf32>
    %35 = math.tanh %34 : vector<8x128xf32>
    %36 = arith.truncf %35 : vector<8x128xf32> to vector<8x128xbf16>
    %cst_12 = arith.constant dense<0.000000e+00> : vector<8x128xf32>
    %37 = tpu.matmul %36, %10, %cst_12 {dimension_numbers = #tpu.dot_dimension_numbers<[1], [0], [0], [1], [0, 0, 1, 1], [], []>} : vector<8x128xbf16>, vector<128x128xbf16>, vector<8x128xf32> -> vector<8x128xf32>
    %38 = vector.extract_strided_slice %9 {offsets = [4, 0, 0], sizes = [1, 8, 128], strides = [1, 1, 1]} : vector<8x8x128xf32> to vector<1x8x128xf32>
    %39 = vector.shape_cast %38 : vector<1x8x128xf32> to vector<8x128xf32>
    %40 = arith.addf %37, %39 : vector<8x128xf32>
    %41 = math.tanh %40 : vector<8x128xf32>
    %42 = arith.truncf %41 : vector<8x128xf32> to vector<8x128xbf16>
    %cst_13 = arith.constant dense<0.000000e+00> : vector<8x128xf32>
    %43 = tpu.matmul %42, %10, %cst_13 {dimension_numbers = #tpu.dot_dimension_numbers<[1], [0], [0], [1], [0, 0, 1, 1], [], []>} : vector<8x128xbf16>, vector<128x128xbf16>, vector<8x128xf32> -> vector<8x128xf32>
    %44 = vector.extract_strided_slice %9 {offsets = [5, 0, 0], sizes = [1, 8, 128], strides = [1, 1, 1]} : vector<8x8x128xf32> to vector<1x8x128xf32>
    %45 = vector.shape_cast %44 : vector<1x8x128xf32> to vector<8x128xf32>
    %46 = arith.addf %43, %45 : vector<8x128xf32>
    %47 = math.tanh %46 : vector<8x128xf32>
    %48 = arith.truncf %47 : vector<8x128xf32> to vector<8x128xbf16>
    %cst_14 = arith.constant dense<0.000000e+00> : vector<8x128xf32>
    %49 = tpu.matmul %48, %10, %cst_14 {dimension_numbers = #tpu.dot_dimension_numbers<[1], [0], [0], [1], [0, 0, 1, 1], [], []>} : vector<8x128xbf16>, vector<128x128xbf16>, vector<8x128xf32> -> vector<8x128xf32>
    %50 = vector.extract_strided_slice %9 {offsets = [6, 0, 0], sizes = [1, 8, 128], strides = [1, 1, 1]} : vector<8x8x128xf32> to vector<1x8x128xf32>
    %51 = vector.shape_cast %50 : vector<1x8x128xf32> to vector<8x128xf32>
    %52 = arith.addf %49, %51 : vector<8x128xf32>
    %53 = math.tanh %52 : vector<8x128xf32>
    %54 = arith.truncf %53 : vector<8x128xf32> to vector<8x128xbf16>
    %cst_15 = arith.constant dense<0.000000e+00> : vector<8x128xf32>
    %55 = tpu.matmul %54, %10, %cst_15 {dimension_numbers = #tpu.dot_dimension_numbers<[1], [0], [0], [1], [0, 0, 1, 1], [], []>} : vector<8x128xbf16>, vector<128x128xbf16>, vector<8x128xf32> -> vector<8x128xf32>
    %56 = vector.extract_strided_slice %9 {offsets = [7, 0, 0], sizes = [1, 8, 128], strides = [1, 1, 1]} : vector<8x8x128xf32> to vector<1x8x128xf32>
    %57 = vector.shape_cast %56 : vector<1x8x128xf32> to vector<8x128xf32>
    %58 = arith.addf %55, %57 : vector<8x128xf32>
    %59 = math.tanh %58 : vector<8x128xf32>
    %c0_16 = arith.constant 0 : index
    %c0_17 = arith.constant 0 : index
    %60 = vector.load %arg4[%c0_16, %c0_17] : memref<128x128xf32, #tpu.memory_space<vmem>>, vector<128x128xf32>
    %cst_18 = arith.constant dense<0.000000e+00> : vector<8x128xf32>
    %61 = tpu.matmul %59, %60, %cst_18 {dimension_numbers = #tpu.dot_dimension_numbers<[1], [0], [0], [1], [0, 0, 1, 1], [], []>} : vector<8x128xf32>, vector<128x128xf32>, vector<8x128xf32> -> vector<8x128xf32>
    %c0_19 = arith.constant 0 : index
    %c0_20 = arith.constant 0 : index
    %62 = vector.load %arg5[%c0_19, %c0_20] : memref<1x128xf32, #tpu.memory_space<vmem>>, vector<1x128xf32>
    %63 = vector.broadcast %62 : vector<1x128xf32> to vector<8x128xf32>
    %64 = arith.addf %61, %63 : vector<8x128xf32>
    %cst_21 = arith.constant dense<0xFF800000> : vector<8xf32>
    %65 = vector.multi_reduction <maximumf>, %64, %cst_21 [1] : vector<8x128xf32> to vector<8xf32>
    %66 = vector.shape_cast %65 : vector<8xf32> to vector<8x1xf32>
    %67 = vector.broadcast %66 : vector<8x1xf32> to vector<8x128xf32>
    %68 = arith.subf %64, %67 : vector<8x128xf32>
    %69 = math.exp %68 : vector<8x128xf32>
    %cst_22 = arith.constant dense<0.000000e+00> : vector<8xf32>
    %70 = vector.multi_reduction <add>, %69, %cst_22 [1] : vector<8x128xf32> to vector<8xf32>
    %71 = vector.shape_cast %70 : vector<8xf32> to vector<8x1xf32>
    %72 = tpu.reciprocal %71 : vector<8x1xf32> -> vector<8x1xf32>
    %73 = vector.broadcast %72 : vector<8x1xf32> to vector<8x128xf32>
    %74 = arith.mulf %69, %73 : vector<8x128xf32>
    %c0_23 = arith.constant 0 : index
    %c0_24 = arith.constant 0 : index
    %75 = vector.load %arg6[%c0_23, %c0_24] : memref<8x128xf32, #tpu.memory_space<vmem>>, vector<8x128xf32>
    tpu.vector_store %arg6[%c0_23, %c0_24], %74 {strides = array<i32>} : memref<8x128xf32, #tpu.memory_space<vmem>>, vector<8x128xf32>,
    return
  }
}

</mosaic_0001>

<bundles_post_ra>
// kernel: tpu_custom_call.1
= control target key start
LH: loop header
LB: loop body
LE: loop exit
PB: predicated region body
PF: predicated region fallthrough
CT: control target
= control target key end

     0   :  { %11 = vsyncpa [#allocation3], 0  ;;  %s1313_s0 = inlined_call_operand.vmem [shape: f32[8,8,1], index: 0, kind: input, shape index: {}]   ;;  %s1314_s1 = inlined_call_operand.vmem [shape: f32[1,128], index: 1, kind: input, shape index: {}]   ;;  %s1315_s2 = inlined_call_operand.vmem [shape: f32[1,128], index: 2, kind: input, shape index: {}]   ;;  %s1316_s3 = inlined_call_operand.vmem [shape: bf16[128,128], index: 3, kind: input, shape index: {}]   ;;  %s1317_s4 = inlined_call_operand.hbm [shape: f32[128,128], index: 4, kind: input, shape index: {}]   ;;  %s1318_s5 = inlined_call_operand.vmem [shape: f32[1,128], index: 5, kind: input, shape index: {}]   ;;  %s1319_s6 = inlined_call_operand.hbm [shape: f32[8,128], index: 6, kind: output, shape index: {}]  }
   0x1   :  { %12 = vsyncpa [#allocation4], 0  ;;  %s1010_s21 = smov [#allocation2]  }
   0x2   :  { %s26_s22 = sshll.u32 %s1010_s21, 4  ;;  %s27_s22 = int_to_ptr.vmem [resolvable:$true] %s26_s22 }
   0x3   :  { %s974_s23 = scalar_lea.vmem %s27_s22, 2048  ;;  %p979_p1 = scmp.lt.s32.totalorder %s27_s22, %s27_s22 }
   0x4   :  { %p975_p0 = scmp.ne.s32.totalorder %s27_s22, %s974_s23  ;;  %p980_p2 = scmp.lt.s32.totalorder %s974_s23, %s974_s23 }
   0x6   :  { %p981_p3 = por %p980_p2, %p979_p1 }
   0x8   :  { %p982_p4 = pnand %p981_p3, %p975_p0 }
   0xa   :  { %985 = shalt.err (!%p982_p4)
}
   0xb   :  { %s1011_s24 = smov 128   ;;  %s1012_s25 = smov 8  }
   0xc   :  { %32 = dma.hbm_to_vmem [thread:$0]  %s1317_s4, 2048, %s27_s22, [#allocation3], %s1011_s24, %s1011_s24, %s1012_s25  }
   0xd   :  { %1006 = dma.done.wait [#allocation3], 2048  }
   0xe   :  { %1007 = vsyncadd [#allocation3], 4294965248  ;;  %v1013_v0 = vmov 0.0   ;;  %vm1014_vm0 = vmmov 0   ;;  %v1015_v1 = vmov 0   ;;  %v1064_v2 = vld [vmem:[%s1316_s3 + $0x38] sm:$0xff]  }
   0xf   :  { %734 = vmatprep.subr.bf16.mxu0 %v1013_v0  ;;  %750 = vmatprep.mubr.msk.bf16.mxu0 %vm1014_vm0, %v1013_v0  ;;  %v1070_v3 = vld [vmem:[%s1316_s3 + $0x30] sm:$0xff]   ;;  %v1079_v4 = vld [vmem:[%s1316_s3 + $0x28] sm:$0xff]   ;;  %v39_v5 = vld [vmem:[%s1313_s0] sm:$0xff]  ;;  %s1016_s12 = smov [#allocation5]  }
  0x10   :  { %936 = vset.pattern.permute.xlu0 %v1015_v1  ;;  %754 = vmatprep.subr.bf16.mxu1 %v1013_v0  ;;  %v1091_v6 = vld [vmem:[%s1316_s3 + $0x20] sm:$0xff]   ;;  %v40_v7 = vld [vmem:[%s1313_s0 + $0x8] sm:$0xff]  ;;  %v1103_v8 = vld [vmem:[%s1316_s3 + $0x18] sm:$0xff]   ;;  %s625_s13 = sshll.u32 %s1016_s12, 4  ;;  %s626_s13 = int_to_ptr.vmem [resolvable:$true] %s625_s13 }
  0x11   :  { %770 = vmatprep.mubr.msk.bf16.mxu1 %vm1014_vm0, %v1013_v0  ;;  %937 = vset.pattern.permute.xlu1 %v1015_v1  ;;  %v43_v9 = vld [vmem:[%s1313_s0 + $0x20] sm:$0xff]  ;;  %v1115_v10 = vld [vmem:[%s1316_s3 + $0x10] sm:$0xff]   ;;  %v1127_v12 = vld [vmem:[%s1316_s3 + $0x8] sm:$0xff]   ;;  %s986_s14 = scalar_lea.vmem %s626_s13, 128  ;;  %p991_p6 = scmp.lt.s32.totalorder %s626_s13, %s626_s13 }
  0x12   :  { %735 = vmatpush3.bf16.msra.mxu0 %v1064_v2  ;;  %755 = vmatpush3.bf16.msra.mxu1 %v1064_v2  ;;  %v45_v11 = vld [vmem:[%s1313_s0 + $0x30] sm:$0xff]  ;;  %v1136_v13 = vld [vmem:[%s1316_s3] sm:$0xff]   ;;  %v42_v27 = vld [vmem:[%s1313_s0 + $0x18] sm:$0xff]  ;;  %p987_p5 = scmp.ne.s32.totalorder %s626_s13, %s986_s14  ;;  %p992_p7 = scmp.lt.s32.totalorder %s986_s14, %s986_s14 }
  0x13   :  { %736 = vmatprep.subr.bf16.mxu0 %v1013_v0  ;;  %756 = vmatprep.subr.bf16.mxu1 %v1013_v0  ;;  %v1166_v14 = vld [vmem:[%s1314_s1] ss:$0 sm:$0xff]  ;;  %v41_v26 = vld [vmem:[%s1313_s0 + $0x10] sm:$0xff]  ;;  %v44_v28 = vld [vmem:[%s1313_s0 + $0x28] sm:$0xff] }
  0x14   :  { %50 = vperm.xlu0 %936, %v39_v5   ;;  %v1172_v17 = vld [vmem:[%s1315_s2] ss:$0 sm:$0xff]  ;;  %60 = vperm.xlu1 %937, %v41_v26   ;;  %v46_v29 = vld [vmem:[%s1313_s0 + $0x38] sm:$0xff]  ;;  %p993_p8 = por %p992_p7, %p991_p6 }
  0x16   :  { %737 = vmatpush3.bf16.msra.mxu0 %v1070_v3  ;;  %757 = vmatpush3.bf16.msra.mxu1 %v1070_v3  ;;  %p994_p9 = pnand %p993_p8, %p987_p5 }
  0x17   :  { %738 = vmatprep.subr.bf16.mxu0 %v1013_v0  ;;  %758 = vmatprep.subr.bf16.mxu1 %v1013_v0 }
  0x18   :  { %55 = vperm.xlu0 %936, %v40_v7   ;;  %65 = vperm.xlu1 %937, %v42_v27  }
  0x1a   :  { %739 = vmatpush3.bf16.msra.mxu0 %v1079_v4  ;;  %759 = vmatpush3.bf16.msra.mxu1 %v1079_v4 }
  0x1b   :  { %740 = vmatprep.subr.bf16.mxu0 %v1013_v0  ;;  %760 = vmatprep.subr.bf16.mxu1 %v1013_v0 }
  0x1c   :  { %70 = vperm.xlu0 %936, %v43_v9   ;;  %75 = vperm.xlu1 %937, %v44_v28  }
  0x1e   :  { %741 = vmatpush3.bf16.msra.mxu0 %v1091_v6  ;;  %761 = vmatpush3.bf16.msra.mxu1 %v1091_v6 }
  0x1f   :  { %742 = vmatprep.subr.bf16.mxu0 %v1013_v0  ;;  %762 = vmatprep.subr.bf16.mxu1 %v1013_v0 }
  0x20   :  { %80 = vperm.xlu0 %936, %v45_v11   ;;  %85 = vperm.xlu1 %937, %v46_v29  }
  0x22   :  { %743 = vmatpush3.bf16.msra.mxu0 %v1103_v8  ;;  %763 = vmatpush3.bf16.msra.mxu1 %v1103_v8 }
  0x23   :  { %744 = vmatprep.subr.bf16.mxu0 %v1013_v0  ;;  %764 = vmatprep.subr.bf16.mxu1 %v1013_v0 }
  0x26   :  { %745 = vmatpush3.bf16.msra.mxu0 %v1115_v10  ;;  %765 = vmatpush3.bf16.msra.mxu1 %v1115_v10 }
  0x27   :  { %746 = vmatprep.subr.bf16.mxu0 %v1013_v0  ;;  %766 = vmatprep.subr.bf16.mxu1 %v1013_v0 }
  0x2a   :  { %747 = vmatpush3.bf16.msra.mxu0 %v1127_v12  ;;  %767 = vmatpush3.bf16.msra.mxu1 %v1127_v12 }
  0x2b   :  { %748 = vmatprep.subr.bf16.mxu0 %v1013_v0  ;;  %768 = vmatprep.subr.bf16.mxu1 %v1013_v0 }
  0x2e   :  { %749 = vmatpush3.bf16.msra.mxu0 %v1136_v13  ;;  %769 = vmatpush3.bf16.msra.mxu1 %v1136_v13 }
  0x2f   :  { %774 = vmatprep.subr.bf16.mxu0 %v1013_v0  ;;  %794 = vmatprep.subr.bf16.mxu1 %v1013_v0 }
  0x31   :  { %751 = vmatmul.mubr.bf16.vlgmr.msra.gmra.mxu0 %v1015_v1 }
  0x32   :  { %775 = vmatpush3.bf16.msra.mxu0 %v1064_v2  ;;  %790 = vmatprep.mubr.msk.bf16.mxu0 %vm1014_vm0, %v1013_v0 }
  0x33   :  { %776 = vmatprep.subr.bf16.mxu0 %v1013_v0 }
  0x36   :  { %777 = vmatpush3.bf16.msra.mxu0 %v1070_v3 }
  0x37   :  { %778 = vmatprep.subr.bf16.mxu0 %v1013_v0 }
  0x3a   :  { %779 = vmatpush3.bf16.msra.mxu0 %v1079_v4 }
  0x3b   :  { %780 = vmatprep.subr.bf16.mxu0 %v1013_v0 }
  0x3e   :  { %781 = vmatpush3.bf16.msra.mxu0 %v1091_v6 }
  0x3f   :  { %782 = vmatprep.subr.bf16.mxu0 %v1013_v0 }
  0x42   :  { %783 = vmatpush3.bf16.msra.mxu0 %v1103_v8 }
  0x43   :  { %784 = vmatprep.subr.bf16.mxu0 %v1013_v0 }
  0x46   :  { %785 = vmatpush3.bf16.msra.mxu0 %v1115_v10 }
  0x47   :  { %786 = vmatprep.subr.bf16.mxu0 %v1013_v0 }
  0x4a   :  { %787 = vmatpush3.bf16.msra.mxu0 %v1127_v12 }
  0x4b   :  { %788 = vmatprep.subr.bf16.mxu0 %v1013_v0 }
  0x4e   :  { %789 = vmatpush3.bf16.msra.mxu0 %v1136_v13 }
  0x4f   :  { %814 = vmatprep.subr.bf16.mxu0 %v1013_v0 }
  0x8f   :  { %v51_v15 = vpop.permute.xlu0 %50  ;;  %v61_v40 = vpop.permute.xlu1 %60 }
  0x90   :  { %v94_v16 = vmul.f32 %v1166_v14, %v51_v15  ;;  %v96_v41 = vmul.f32 %v1166_v14, %v61_v40  ;;  %v520_v40 = vld [vmem:[#allocation2 + $0x20] sm:$0xff] }
  0x92   :  { %v109_v18 = vadd.f32 %v1172_v17, %v94_v16  ;;  %v111_v42 = vadd.f32 %v1172_v17, %v96_v41  ;;  %v519_v41 = vld [vmem:[#allocation2 + $0x18] sm:$0xff] }
  0x93   :  { %v56_v30 = vpop.permute.xlu0 %55  ;;  %v66_v50 = vpop.permute.xlu1 %65 }
  0x94   :  { %v95_v31 = vmul.f32 %v1166_v14, %v56_v30  ;;  %v97_v51 = vmul.f32 %v1166_v14, %v66_v50 }
  0x96   :  { %v110_v32 = vadd.f32 %v1172_v17, %v95_v31  ;;  %v112_v52 = vadd.f32 %v1172_v17, %v97_v51 }
  0x97   :  { %v71_v60 = vpop.permute.xlu0 %70 }
  0x98   :  { %v98_v61 = vmul.f32 %v1166_v14, %v71_v60 }
  0x9a   :  { %v113_v62 = vadd.f32 %v1172_v17, %v98_v61 }
  0x9b   :  { %v81_v26 = vpop.permute.xlu0 %80 }
  0x9c   :  { %v100_v27 = vmul.f32 %v1166_v14, %v81_v26 }
  0x9e   :  { %v115_v28 = vadd.f32 %v1172_v17, %v100_v27 }
  0xf1   :  { %v215_v19 = vpop.f32.mrf.mxu0 }
  0xf2   :  { %v216_v20 = vadd.f32 %v215_v19, %v109_v18 }
  0xf3   :  { %v752_v21 = vpop.f32.mrf.mxu0 }
  0xf4   :  { %946 = vtanh.f32 %v216_v20  ;;  %v530_v21 = vld [vmem:[#allocation2 + $0x70] sm:$0xff] }
  0xf5   :  { %v218_v22 = vpop.f32.mrf.mxu0 }
  0xf6   :  { %v528_v22 = vld [vmem:[#allocation2 + $0x60] sm:$0xff] }
  0xf7   :  { %v753_v23 = vpop.f32.mrf.mxu0 }
  0xf8   :  { %v527_v23 = vld [vmem:[#allocation2 + $0x58] sm:$0xff] }
 0x101   :  { %v947_v24 = vpop.eup %946 }
 0x102   :  { %v222_v25 = vpack.c.bf16 %v947_v24, %v947_v24  ;;  %v526_v24 = vld [vmem:[#allocation2 + $0x50] sm:$0xff] }
 0x104   :  { %771 = vmatmul.mubr.bf16.vlgmr.msra.gmra.mxu1 %v222_v25  ;;  %v525_v25 = vld [vmem:[#allocation2 + $0x48] sm:$0xff] }
 0x105   :  { %795 = vmatpush3.bf16.msra.mxu1 %v1064_v2  ;;  %810 = vmatprep.mubr.msk.bf16.mxu1 %vm1014_vm0, %v1013_v0 }
 0x106   :  { %796 = vmatprep.subr.bf16.mxu1 %v1013_v0 }
 0x109   :  { %797 = vmatpush3.bf16.msra.mxu1 %v1070_v3 }
 0x10a   :  { %798 = vmatprep.subr.bf16.mxu1 %v1013_v0 }
 0x10d   :  { %799 = vmatpush3.bf16.msra.mxu1 %v1079_v4 }
 0x10e   :  { %800 = vmatprep.subr.bf16.mxu1 %v1013_v0 }
 0x111   :  { %801 = vmatpush3.bf16.msra.mxu1 %v1091_v6 }
 0x112   :  { %802 = vmatprep.subr.bf16.mxu1 %v1013_v0 }
 0x115   :  { %803 = vmatpush3.bf16.msra.mxu1 %v1103_v8 }
 0x116   :  { %804 = vmatprep.subr.bf16.mxu1 %v1013_v0 }
 0x119   :  { %805 = vmatpush3.bf16.msra.mxu1 %v1115_v10 }
 0x11a   :  { %806 = vmatprep.subr.bf16.mxu1 %v1013_v0 }
 0x11d   :  { %807 = vmatpush3.bf16.msra.mxu1 %v1127_v12 }
 0x11e   :  { %808 = vmatprep.subr.bf16.mxu1 %v1013_v0 }
 0x121   :  { %809 = vmatpush3.bf16.msra.mxu1 %v1136_v13 }
 0x122   :  { %834 = vmatprep.subr.bf16.mxu1 %v1013_v0 }
 0x1c4   :  { %v257_v33 = vpop.f32.mrf.mxu1 }
 0x1c5   :  { %v258_v34 = vadd.f32 %v257_v33, %v110_v32 }
 0x1c6   :  { %v772_v35 = vpop.f32.mrf.mxu1 }
 0x1c7   :  { %948 = vtanh.f32 %v258_v34 }
 0x1c8   :  { %v260_v36 = vpop.f32.mrf.mxu1 }
 0x1c9   :  { %v524_v36 = vld [vmem:[#allocation2 + $0x40] sm:$0xff] }
 0x1ca   :  { %v773_v37 = vpop.f32.mrf.mxu1 }
 0x1cb   :  { %v523_v37 = vld [vmem:[#allocation2 + $0x38] sm:$0xff] }
 0x1d4   :  { %v949_v38 = vpop.eup %948 }
 0x1d5   :  { %v264_v39 = vpack.c.bf16 %v949_v38, %v949_v38  ;;  %v522_v38 = vld [vmem:[#allocation2 + $0x30] sm:$0xff] }
 0x1d7   :  { %791 = vmatmul.mubr.bf16.vlgmr.msra.gmra.mxu0 %v264_v39  ;;  %v521_v39 = vld [vmem:[#allocation2 + $0x28] sm:$0xff] }
 0x1d8   :  { %815 = vmatpush3.bf16.msra.mxu0 %v1064_v2  ;;  %830 = vmatprep.mubr.msk.bf16.mxu0 %vm1014_vm0, %v1013_v0 }
 0x1d9   :  { %816 = vmatprep.subr.bf16.mxu0 %v1013_v0 }
 0x1dc   :  { %817 = vmatpush3.bf16.msra.mxu0 %v1070_v3 }
 0x1dd   :  { %818 = vmatprep.subr.bf16.mxu0 %v1013_v0 }
 0x1e0   :  { %819 = vmatpush3.bf16.msra.mxu0 %v1079_v4 }
 0x1e1   :  { %820 = vmatprep.subr.bf16.mxu0 %v1013_v0 }
 0x1e4   :  { %821 = vmatpush3.bf16.msra.mxu0 %v1091_v6 }
 0x1e5   :  { %822 = vmatprep.subr.bf16.mxu0 %v1013_v0 }
 0x1e8   :  { %823 = vmatpush3.bf16.msra.mxu0 %v1103_v8 }
 0x1e9   :  { %824 = vmatprep.subr.bf16.mxu0 %v1013_v0 }
 0x1ec   :  { %825 = vmatpush3.bf16.msra.mxu0 %v1115_v10 }
 0x1ed   :  { %826 = vmatprep.subr.bf16.mxu0 %v1013_v0 }
 0x1f0   :  { %827 = vmatpush3.bf16.msra.mxu0 %v1127_v12 }
 0x1f1   :  { %828 = vmatprep.subr.bf16.mxu0 %v1013_v0 }
 0x1f4   :  { %829 = vmatpush3.bf16.msra.mxu0 %v1136_v13 }
 0x1f5   :  { %854 = vmatprep.subr.bf16.mxu0 %v1013_v0 }
 0x297   :  { %v299_v43 = vpop.f32.mrf.mxu0 }
 0x298   :  { %v300_v44 = vadd.f32 %v299_v43, %v111_v42  ;;  %v518_v42 = vld [vmem:[#allocation2 + $0x10] sm:$0xff]  ;;  %v517_v43 = vld [vmem:[#allocation2 + $0x8] sm:$0xff] }
 0x299   :  { %v792_v45 = vpop.f32.mrf.mxu0 }
 0x29a   :  { %950 = vtanh.f32 %v300_v44  ;;  %v516_v44 = vld [vmem:[#allocation2] sm:$0xff] }
 0x29b   :  { %v302_v46 = vpop.f32.mrf.mxu0 }
 0x29d   :  { %v793_v47 = vpop.f32.mrf.mxu0 }
 0x2a7   :  { %v951_v48 = vpop.eup %950 }
 0x2a8   :  { %v306_v49 = vpack.c.bf16 %v951_v48, %v951_v48 }
 0x2aa   :  { %811 = vmatmul.mubr.bf16.vlgmr.msra.gmra.mxu1 %v306_v49 }
 0x2ab   :  { %835 = vmatpush3.bf16.msra.mxu1 %v1064_v2  ;;  %850 = vmatprep.mubr.msk.bf16.mxu1 %vm1014_vm0, %v1013_v0 }
 0x2ac   :  { %836 = vmatprep.subr.bf16.mxu1 %v1013_v0 }
 0x2af   :  { %837 = vmatpush3.bf16.msra.mxu1 %v1070_v3 }
 0x2b0   :  { %838 = vmatprep.subr.bf16.mxu1 %v1013_v0 }
 0x2b3   :  { %839 = vmatpush3.bf16.msra.mxu1 %v1079_v4 }
 0x2b4   :  { %840 = vmatprep.subr.bf16.mxu1 %v1013_v0 }
 0x2b7   :  { %841 = vmatpush3.bf16.msra.mxu1 %v1091_v6 }
 0x2b8   :  { %842 = vmatprep.subr.bf16.mxu1 %v1013_v0 }
 0x2bb   :  { %843 = vmatpush3.bf16.msra.mxu1 %v1103_v8 }
 0x2bc   :  { %844 = vmatprep.subr.bf16.mxu1 %v1013_v0 }
 0x2bf   :  { %845 = vmatpush3.bf16.msra.mxu1 %v1115_v10 }
 0x2c0   :  { %846 = vmatprep.subr.bf16.mxu1 %v1013_v0 }
 0x2c3   :  { %847 = vmatpush3.bf16.msra.mxu1 %v1127_v12 }
 0x2c4   :  { %848 = vmatprep.subr.bf16.mxu1 %v1013_v0 }
 0x2c7   :  { %849 = vmatpush3.bf16.msra.mxu1 %v1136_v13 }
 0x2c8   :  { %874 = vmatprep.subr.bf16.mxu1 %v1013_v0 }
 0x36a   :  { %v341_v53 = vpop.f32.mrf.mxu1 }
 0x36b   :  { %v342_v54 = vadd.f32 %v341_v53, %v112_v52 }
 0x36c   :  { %v812_v55 = vpop.f32.mrf.mxu1 }
 0x36d   :  { %952 = vtanh.f32 %v342_v54  ;;  %v644_v54 = vld [vmem:[%s1318_s5] ss:$0 sm:$0xff] }
 0x36e   :  { %v344_v56 = vpop.f32.mrf.mxu1 }
 0x370   :  { %v813_v57 = vpop.f32.mrf.mxu1 }
 0x37a   :  { %v953_v58 = vpop.eup %952 }
 0x37b   :  { %v348_v59 = vpack.c.bf16 %v953_v58, %v953_v58 }
 0x37d   :  { %831 = vmatmul.mubr.bf16.vlgmr.msra.gmra.mxu0 %v348_v59 }
 0x37e   :  { %855 = vmatpush3.bf16.msra.mxu0 %v1064_v2  ;;  %870 = vmatprep.mubr.msk.bf16.mxu0 %vm1014_vm0, %v1013_v0 }
 0x37f   :  { %856 = vmatprep.subr.bf16.mxu0 %v1013_v0 }
 0x382   :  { %857 = vmatpush3.bf16.msra.mxu0 %v1070_v3 }
 0x383   :  { %858 = vmatprep.subr.bf16.mxu0 %v1013_v0 }
 0x386   :  { %859 = vmatpush3.bf16.msra.mxu0 %v1079_v4 }
 0x387   :  { %860 = vmatprep.subr.bf16.mxu0 %v1013_v0 }
 0x38a   :  { %861 = vmatpush3.bf16.msra.mxu0 %v1091_v6 }
 0x38b   :  { %862 = vmatprep.subr.bf16.mxu0 %v1013_v0 }
 0x38e   :  { %863 = vmatpush3.bf16.msra.mxu0 %v1103_v8 }
 0x38f   :  { %864 = vmatprep.subr.bf16.mxu0 %v1013_v0 }
 0x392   :  { %865 = vmatpush3.bf16.msra.mxu0 %v1115_v10 }
 0x393   :  { %866 = vmatprep.subr.bf16.mxu0 %v1013_v0 }
 0x396   :  { %867 = vmatpush3.bf16.msra.mxu0 %v1127_v12 }
 0x397   :  { %868 = vmatprep.subr.bf16.mxu0 %v1013_v0 }
 0x39a   :  { %869 = vmatpush3.bf16.msra.mxu0 %v1136_v13 }
 0x39b   :  { %894 = vmatprep.subr.mxu0 %v1013_v0 }
 0x43d   :  { %v383_v63 = vpop.f32.mrf.mxu0 }
 0x43e   :  { %v384_v1 = vadd.f32 %v383_v63, %v113_v62 }
 0x43f   :  { %v832_v5 = vpop.f32.mrf.mxu0 }
 0x440   :  { %954 = vtanh.f32 %v384_v1 }
 0x441   :  { %v386_v7 = vpop.f32.mrf.mxu0 }
 0x443   :  { %v833_v9 = vpop.f32.mrf.mxu0 }
 0x44d   :  { %v955_v11 = vpop.eup %954 }
 0x44e   :  { %v390_v15 = vpack.c.bf16 %v955_v11, %v955_v11 }
 0x450   :  { %851 = vmatmul.mubr.bf16.vlgmr.msra.gmra.mxu1 %v390_v15 }
 0x451   :  { %875 = vmatpush3.bf16.msra.mxu1 %v1064_v2  ;;  %890 = vmatprep.mubr.msk.bf16.mxu1 %vm1014_vm0, %v1013_v0  ;;  %v76_v2 = vpop.permute.xlu1 %75 }
 0x452   :  { %876 = vmatprep.subr.bf16.mxu1 %v1013_v0 }
 0x455   :  { %877 = vmatpush3.bf16.msra.mxu1 %v1070_v3  ;;  %v99_v3 = vmul.f32 %v1166_v14, %v76_v2  ;;  %v86_v45 = vpop.permute.xlu1 %85 }
 0x456   :  { %878 = vmatprep.subr.bf16.mxu1 %v1013_v0  ;;  %v101_v46 = vmul.f32 %v1166_v14, %v86_v45 }
 0x458   :  { %v116_v47 = vadd.f32 %v1172_v17, %v101_v46 }
 0x459   :  { %879 = vmatpush3.bf16.msra.mxu1 %v1079_v4  ;;  %v114_v4 = vadd.f32 %v1172_v17, %v99_v3 }
 0x45a   :  { %880 = vmatprep.subr.bf16.mxu1 %v1013_v0 }
 0x45d   :  { %881 = vmatpush3.bf16.msra.mxu1 %v1091_v6 }
 0x45e   :  { %882 = vmatprep.subr.bf16.mxu1 %v1013_v0 }
 0x461   :  { %883 = vmatpush3.bf16.msra.mxu1 %v1103_v8 }
 0x462   :  { %884 = vmatprep.subr.bf16.mxu1 %v1013_v0 }
 0x465   :  { %885 = vmatpush3.bf16.msra.mxu1 %v1115_v10 }
 0x466   :  { %886 = vmatprep.subr.bf16.mxu1 %v1013_v0 }
 0x469   :  { %887 = vmatpush3.bf16.msra.mxu1 %v1127_v12  ;;  %v531_v12 = vld [vmem:[#allocation2 + $0x78] sm:$0xff] }
 0x46a   :  { %888 = vmatprep.subr.bf16.mxu1 %v1013_v0 }
 0x46d   :  { %889 = vmatpush3.bf16.msra.mxu1 %v1136_v13  ;;  %v529_v13 = vld [vmem:[#allocation2 + $0x68] sm:$0xff] }
 0x510   :  { %v425_v6 = vpop.f32.mrf.mxu1 }
 0x511   :  { %v426_v16 = vadd.f32 %v425_v6, %v114_v4 }
 0x512   :  { %v852_v8 = vpop.f32.mrf.mxu1 }
 0x513   :  { %956 = vtanh.f32 %v426_v16 }
 0x514   :  { %v428_v18 = vpop.f32.mrf.mxu1 }
 0x516   :  { %v853_v19 = vpop.f32.mrf.mxu1 }
 0x520   :  { %v957_v10 = vpop.eup %956 }
 0x521   :  { %v432_v20 = vpack.c.bf16 %v957_v10, %v957_v10 }
 0x523   :  { %871 = vmatmul.mubr.bf16.vlgmr.msra.gmra.mxu0 %v432_v20 }
 0x524   :  { %926 = vmatprep.mubr.msk.f32.mxu0 %vm1014_vm0, %v1013_v0  ;;  %895 = vmatpush3.msra.mxu0 %v531_v12 }
 0x525   :  { %896 = vmatprep.subr.mxu0 %v1013_v0 }
 0x526   :  { %897 = vmatpush3.msra.mxu0 %v530_v21 }
 0x527   :  { %898 = vmatprep.subr.mxu0 %v1013_v0 }
 0x528   :  { %899 = vmatpush3.msra.mxu0 %v529_v13 }
 0x529   :  { %900 = vmatprep.subr.mxu0 %v1013_v0 }
 0x52a   :  { %901 = vmatpush3.msra.mxu0 %v528_v22 }
 0x52b   :  { %902 = vmatprep.subr.mxu0 %v1013_v0 }
 0x52c   :  { %903 = vmatpush3.msra.mxu0 %v527_v23 }
 0x52d   :  { %904 = vmatprep.subr.mxu0 %v1013_v0 }
 0x52e   :  { %905 = vmatpush3.msra.mxu0 %v526_v24 }
 0x52f   :  { %906 = vmatprep.subr.mxu0 %v1013_v0 }
 0x530   :  { %907 = vmatpush3.msra.mxu0 %v525_v25 }
 0x531   :  { %908 = vmatprep.subr.mxu0 %v1013_v0 }
 0x532   :  { %909 = vmatpush3.msra.mxu0 %v524_v36 }
 0x533   :  { %910 = vmatprep.subr.mxu0 %v1013_v0 }
 0x534   :  { %911 = vmatpush3.msra.mxu0 %v523_v37 }
 0x535   :  { %912 = vmatprep.subr.mxu0 %v1013_v0 }
 0x536   :  { %913 = vmatpush3.msra.mxu0 %v522_v38 }
 0x537   :  { %914 = vmatprep.subr.mxu0 %v1013_v0 }
 0x538   :  { %915 = vmatpush3.msra.mxu0 %v521_v39 }
 0x539   :  { %916 = vmatprep.subr.mxu0 %v1013_v0 }
 0x53a   :  { %917 = vmatpush3.msra.mxu0 %v520_v40 }
 0x53b   :  { %918 = vmatprep.subr.mxu0 %v1013_v0 }
 0x53c   :  { %919 = vmatpush3.msra.mxu0 %v519_v41 }
 0x53d   :  { %920 = vmatprep.subr.mxu0 %v1013_v0 }
 0x53e   :  { %921 = vmatpush3.msra.mxu0 %v518_v42 }
 0x53f   :  { %922 = vmatprep.subr.mxu0 %v1013_v0 }
 0x540   :  { %923 = vmatpush3.msra.mxu0 %v517_v43 }
 0x541   :  { %924 = vmatprep.subr.mxu0 %v1013_v0 }
 0x542   :  { %925 = vmatpush3.msra.mxu0 %v516_v44 }
 0x5e3   :  { %v467_v29 = vpop.f32.mrf.mxu0 }
 0x5e4   :  { %v468_v30 = vadd.f32 %v467_v29, %v115_v28 }
 0x5e5   :  { %v872_v31 = vpop.f32.mrf.mxu0 }
 0x5e6   :  { %958 = vtanh.f32 %v468_v30 }
 0x5e7   :  { %v470_v32 = vpop.f32.mrf.mxu0 }
 0x5e9   :  { %v873_v33 = vpop.f32.mrf.mxu0 }
 0x5f3   :  { %v959_v34 = vpop.eup %958 }
 0x5f4   :  { %v474_v35 = vpack.c.bf16 %v959_v34, %v959_v34 }
 0x5f6   :  { %891 = vmatmul.mubr.bf16.vlgmr.msra.gmra.mxu1 %v474_v35 }
 0x6b6   :  { %v509_v48 = vpop.f32.mrf.mxu1 }
 0x6b7   :  { %v510_v49 = vadd.f32 %v509_v48, %v116_v47 }
 0x6b8   :  { %v892_v50 = vpop.f32.mrf.mxu1 }
 0x6b9   :  { %960 = vtanh.f32 %v510_v49 }
 0x6ba   :  { %v512_v51 = vpop.f32.mrf.mxu1 }
 0x6bc   :  { %v893_v52 = vpop.f32.mrf.mxu1 }
 0x6c6   :  { %v961_v53 = vpop.eup %960 }
 0x6c7   :  { %927 = vmatmul.mubr.f32.vlgmr.msra.gmra.mxu0 %v961_v53 }
 0x787   :  { %v605_v55 = vpop.f32.mrf.mxu0 }
 0x788   :  { %v606_v0 = vadd.f32 %v644_v54, %v605_v55 }
 0x789   :  { %v928_v56 = vpop.f32.mrf.mxu0 }
 0x78a   :  { %609 = vmax.xlane.f32.xlu0 %v606_v0 }
 0x813   :  { %v610_v57 = vpop.xlane.xlu0 %609 }
 0x814   :  { %v611_v14 = vsub.f32 %v606_v0, %v610_v57 }
 0x816   :  { %v612_v58 = vmul.f32 1.442695, %v611_v14 }
 0x818   :  { %962 = vpow2.f32 %v612_v58 }
 0x825   :  { %v963_v17 = vpop.eup %962 }
 0x826   :  { %614 = vadd.xlane.f32.xlu1 %v963_v17 }
 0x8af   :  { %v615_v59 = vpop.xlane.xlu1 %614 }
 0x8b0   :  { %964 = vrcp.f32 %v615_v59 }
 0x8bd   :  { %v965_v60 = vpop.eup %964 }
 0x8be   :  { %v617_v61 = vmul.f32 %v965_v60, %v963_v17 }
 0x8c0   :  { %618 = vst [vmem:[#allocation5] sm:$0xff] %v617_v61 }
 0x8c1   :  { %997 = shalt.err (!%p994_p9)
}
 0x8c2   :  { %628 = dma.vmem_to_hbm [thread:$0]  %s626_s13, 128, %s1319_s6, [#allocation4]  }
 0x8c3   :  { %1008 = dma.done.wait [#allocation4], 128  }
 0x8c4   :  { %1009 = vsyncadd [#allocation4], 4294967168 }
 0x8c5   :  { %632 = vsyncpa [#allocation3], 1 }
 0x8c6   :  { %633 = vsyncpa [#allocation4], 1 }

</bundles_post_ra>
